<compile_context>
chip_gen: v7x
topology: tpu7x:2x2x1
jax: 0.10.0
libtpu: 0.0.40
codegen_flags: <defaults>
</compile_context>

<pallas_src>
import functools

import jax
import jax.numpy as jnp
from jax import lax
from jax.experimental import pallas as pl
from jax.experimental.pallas import tpu as pltpu


def _round_up(x, m):
    return ((x + m - 1) // m) * m


def _spatial_attention_kernel(w1_ref, w2_ref, wmix_ref, x_ref, out_ref, mp_ref,
                              *, H, W):
    # w1_ref:   (9,)              SMEM  flattened 3x3 conv weight
    # w2_ref:   (1,)              SMEM  1x1 single-channel conv weight (scalar)
    # wmix_ref: (F, C)            VMEM  layer2 1x1 conv weight (resident)
    # x_ref:    (1, C, H*W)       VMEM  one batch element, HW lane-dense
    # out_ref:  (1, F, H*W)       VMEM
    # mp_ref:   (1, 2*pad + H*W)  VMEM  lane-flat zero-padded mean plane
    C = x_ref.shape[1]
    HW = H * W
    pad = (mp_ref.shape[1] - HW) // 2

    # ---- per-channel planes, each (1, HW) lane-dense ----
    xs = [x_ref[0, c:c + 1, :] for c in range(C)]

    # ---- channel mean: unrolled VPU adds (no cross-lane reduction) ----
    m = xs[0]
    for c in range(1, C):
        m = m + xs[c]
    m = m * (1.0 / C)                                      # (1, HW)

    # ---- layer1: 3x3 SAME conv (1 channel, no bias) on the flat plane ----
    # Zero the two pads, store m lane-aligned in the center, then read the 9
    # taps as statically shifted slices.  Row out-of-range reads land in the
    # zero pad; column wrap (j-1 at j==0, j+1 at j==W-1) is killed with lane
    # masks.  (Pads are re-zeroed every step: scratch is uninitialized and a
    # megacore split means program_id(0)==0 may never run on a given core.)
    mp_ref[:, :pad] = jnp.zeros((1, pad), jnp.float32)
    mp_ref[:, pad + HW:] = jnp.zeros((1, pad), jnp.float32)
    mp_ref[:, pad:pad + HW] = m

    col = lax.broadcasted_iota(jnp.int32, (1, HW), 1) % W
    ok_l = col > 0                 # j-1 is a real neighbour
    ok_r = col < (W - 1)           # j+1 is a real neighbour

    acc = jnp.zeros((1, HW), jnp.float32)
    for ky in range(3):
        for kx in range(3):
            s = (ky - 1) * W + (kx - 1)
            v = mp_ref[:, pad + s:pad + s + HW]            # (1, HW)
            if kx == 0:
                v = jnp.where(ok_l, v, 0.0)
            elif kx == 2:
                v = jnp.where(ok_r, v, 0.0)
            acc = acc + w1_ref[ky * 3 + kx] * v

    a = jax.nn.sigmoid(jnp.maximum(acc, 0.0) * w2_ref[0])  # (1, HW)

    # ---- layer2: 1x1 conv C->F + sigmoid as C+1 VPU broadcast-FMA terms ----
    #   z[f,:] = sum_c wmix[f,c]*(x[c,:] + a)
    #          = sum_c wmix[f,c]*x[c,:] + (sum_c wmix[f,c]) * a
    wcols = [wmix_ref[:, c:c + 1] for c in range(C)]       # each (F, 1)
    wsum = wcols[0]
    for c in range(1, C):
        wsum = wsum + wcols[c]

    z = a * wsum                                           # (1,HW)*(F,1) -> (F,HW)
    for c in range(C):
        z = z + xs[c] * wcols[c]
    out_ref[0] = jax.nn.sigmoid(z).astype(out_ref.dtype)   # one dense (F, HW) store


@jax.jit
def spatial_attention(x_nchw, w1, w2, wmix):
    """x_nchw: (N, C, H, W). w1: (1,1,3,3), w2: (1,1,1,1), wmix: (F, C, 1, 1)."""
    N, C, H, W = x_nchw.shape
    F = wmix.shape[0]
    HW = H * W
    pad = _round_up(W + 1, 128)                            # zero pad per side (>= W+1)

    x_flat = x_nchw.reshape(N, C, HW).astype(jnp.float32)  # free reshape, no transpose
    w1_flat = w1.reshape(9).astype(jnp.float32)
    w2_flat = w2.reshape(1).astype(jnp.float32)
    wmix_fc = wmix.reshape(F, C).astype(jnp.float32)

    # Scoped-VMEM budget: double-buffered x/out blocks + scratch + headroom,
    # capped at v7x's 64 MiB physical VMEM per TensorCore.
    block_bytes = 4 * HW * (C + F)
    scratch_bytes = 4 * (HW + 2 * pad)
    vmem_limit = int(min(max(2 * block_bytes + scratch_bytes + (2 << 20), 16 << 20),
                         64 << 20))

    out_flat = pl.pallas_call(
        functools.partial(_spatial_attention_kernel, H=H, W=W),
        out_shape=jax.ShapeDtypeStruct((N, F, HW), jnp.float32),
        grid=(N,),
        in_specs=[
            pl.BlockSpec(memory_space=pltpu.MemorySpace.SMEM),      # w1 (9,)
            pl.BlockSpec(memory_space=pltpu.MemorySpace.SMEM),      # w2 (1,)
            pl.BlockSpec((F, C), lambda b: (0, 0)),                 # wmix, resident
            pl.BlockSpec((1, C, HW), lambda b: (b, 0, 0)),          # x
        ],
        out_specs=pl.BlockSpec((1, F, HW), lambda b: (b, 0, 0)),
        scratch_shapes=[pltpu.VMEM((1, HW + 2 * pad), jnp.float32)],
        compiler_params=pltpu.CompilerParams(
            dimension_semantics=("parallel",),
            vmem_limit_bytes=vmem_limit),
    )(w1_flat, w2_flat, wmix_fc, x_flat)

    return out_flat.reshape(N, F, H, W)                    # already NCHW


def reference(x, w1, w2, wmix):
    """Pure-JAX reference of the PyTorch forward (NCHW)."""
    F, C = wmix.shape[0], wmix.shape[1]
    m = jnp.mean(x, axis=1, keepdims=True)
    a = lax.conv_general_dilated(m, w1, (1, 1), padding=((1, 1), (1, 1)),
                                 dimension_numbers=("NCHW", "OIHW", "NCHW"))
    a = jnp.maximum(a, 0.0)
    a = jax.nn.sigmoid(a * w2.reshape(()))
    y = a + x
    z = jnp.einsum("nchw,fc->nfhw", y, wmix.reshape(F, C))
    return jax.nn.sigmoid(z)


if __name__ == "__main__":
    # small shapes consistent with the module
    N, C, H, W = 2, 4, 16, 16
    num_features = 8

    key = jax.random.PRNGKey(0)
    key_x, k1, k2, k3 = jax.random.split(key, 4)

    x = jax.random.normal(key_x, (N, C, H, W), dtype=jnp.float32)

    # deterministic kaiming_normal_-style init (fan_in mode, gain sqrt(2))
    w1 = jax.random.normal(k1, (1, 1, 3, 3), jnp.float32) * jnp.sqrt(2.0 / 9.0)
    w2 = jax.random.normal(k2, (1, 1, 1, 1), jnp.float32) * jnp.sqrt(2.0 / 1.0)
    wmix = jax.random.normal(k3, (num_features, C, 1, 1), jnp.float32) * jnp.sqrt(2.0 / C)

    out = jax.block_until_ready(spatial_attention(x, w1, w2, wmix))
    ref = jax.block_until_ready(reference(x, w1, w2, wmix))

    assert out.shape == (N, num_features, H, W), out.shape
    max_err = float(jnp.max(jnp.abs(out - ref)))
    assert jnp.allclose(out, ref, atol=1e-3, rtol=1e-3), max_err

    print("KERNEL_OK")
</pallas_src>

<mosaic_0001>
module attributes {stable_mosaic.version = 11 : i64} {
  func.func @_spatial_attention_kernel(%arg0: i32, %arg1: memref<9xf32, #tpu.memory_space<smem>>, %arg2: memref<1xf32, #tpu.memory_space<smem>>, %arg3: memref<8x4xf32, #tpu.memory_space<vmem>>, %arg4: memref<1x4x256xf32, #tpu.memory_space<vmem>>, %arg5: memref<1x8x256xf32, #tpu.memory_space<vmem>>, %arg6: memref<1x512xf32, #tpu.memory_space<vmem>>) attributes {dimension_semantics = [#tpu.dimension_semantics<parallel>], iteration_bounds = array<i64: 2>, scalar_prefetch = 0 : i64, scratch_operands = 1 : i64, tpu.core_type = #tpu.core_type<tc>, window_params = [{transform_indices = @transform_0, window_bounds = array<i64: 9>}, {transform_indices = @transform_1, window_bounds = array<i64: 1>}, {pipeline_mode = #tpu.pipeline_mode<synchronous>, transform_indices = @transform_2, window_bounds = array<i64: 8, 4>}, {transform_indices = @transform_3, window_bounds = array<i64: 1, 4, 256>}, {transform_indices = @transform_4, window_bounds = array<i64: 1, 8, 256>}]} {
    %c0 = arith.constant 0 : index
    %c0_0 = arith.constant 0 : index
    %c0_1 = arith.constant 0 : index
    %0 = vector.load %arg4[%c0, %c0_0, %c0_1] : memref<1x4x256xf32, #tpu.memory_space<vmem>>, vector<1x1x256xf32>
    %1 = vector.shape_cast %0 : vector<1x1x256xf32> to vector<1x256xf32>
    %c0_2 = arith.constant 0 : index
    %c1 = arith.constant 1 : index
    %c0_3 = arith.constant 0 : index
    %2 = vector.load %arg4[%c0_2, %c1, %c0_3] : memref<1x4x256xf32, #tpu.memory_space<vmem>>, vector<1x1x256xf32>
    %3 = vector.shape_cast %2 : vector<1x1x256xf32> to vector<1x256xf32>
    %c0_4 = arith.constant 0 : index
    %c2 = arith.constant 2 : index
    %c0_5 = arith.constant 0 : index
    %4 = vector.load %arg4[%c0_4, %c2, %c0_5] : memref<1x4x256xf32, #tpu.memory_space<vmem>>, vector<1x1x256xf32>
    %5 = vector.shape_cast %4 : vector<1x1x256xf32> to vector<1x256xf32>
    %c0_6 = arith.constant 0 : index
    %c3 = arith.constant 3 : index
    %c0_7 = arith.constant 0 : index
    %6 = vector.load %arg4[%c0_6, %c3, %c0_7] : memref<1x4x256xf32, #tpu.memory_space<vmem>>, vector<1x1x256xf32>
    %7 = vector.shape_cast %6 : vector<1x1x256xf32> to vector<1x256xf32>
    %8 = arith.addf %1, %3 : vector<1x256xf32>
    %9 = arith.addf %8, %5 : vector<1x256xf32>
    %10 = arith.addf %9, %7 : vector<1x256xf32>
    %cst = arith.constant 2.500000e-01 : f32
    %11 = vector.broadcast %cst : f32 to vector<1x256xf32>
    %12 = arith.mulf %10, %11 : vector<1x256xf32>
    %cst_8 = arith.constant 0.000000e+00 : f32
    %13 = vector.broadcast %cst_8 : f32 to vector<1x128xf32>
    %c0_9 = arith.constant 0 : index
    %c0_10 = arith.constant 0 : index
    %14 = vector.load %arg6[%c0_9, %c0_10] : memref<1x512xf32, #tpu.memory_space<vmem>>, vector<1x128xf32>
    tpu.vector_store %arg6[%c0_9, %c0_10], %13 {strides = array<i32>} : memref<1x512xf32, #tpu.memory_space<vmem>>, vector<1x128xf32>,
    %cst_11 = arith.constant 0.000000e+00 : f32
    %15 = vector.broadcast %cst_11 : f32 to vector<1x128xf32>
    %c0_12 = arith.constant 0 : index
    %c384 = arith.constant 384 : index
    %16 = vector.load %arg6[%c0_12, %c384] : memref<1x512xf32, #tpu.memory_space<vmem>>, vector<1x128xf32>
    tpu.vector_store %arg6[%c0_12, %c384], %15 {strides = array<i32>} : memref<1x512xf32, #tpu.memory_space<vmem>>, vector<1x128xf32>,
    %c0_13 = arith.constant 0 : index
    %c128 = arith.constant 128 : index
    %17 = vector.load %arg6[%c0_13, %c128] : memref<1x512xf32, #tpu.memory_space<vmem>>, vector<1x256xf32>
    tpu.vector_store %arg6[%c0_13, %c128], %12 {strides = array<i32>} : memref<1x512xf32, #tpu.memory_space<vmem>>, vector<1x256xf32>,
    %18 = tpu.iota {dimensions = array<i32: 1>} : vector<1x256xi32>
    %c16_i32 = arith.constant 16 : i32
    %c0_i32 = arith.constant 0 : i32
    %19 = arith.cmpi eq, %c16_i32, %c0_i32 : i32
    %c1_i32 = arith.constant 1 : i32
    %20 = arith.select %19, %c1_i32, %c16_i32 : i32
    %21 = vector.broadcast %20 : i32 to vector<1x256xi32>
    %22 = arith.remsi %18, %21 : vector<1x256xi32>
    %c0_i32_14 = arith.constant 0 : i32
    %23 = vector.broadcast %c0_i32_14 : i32 to vector<1x256xi32>
    %24 = arith.cmpi ne, %22, %23 : vector<1x256xi32>
    %c0_i32_15 = arith.constant 0 : i32
    %25 = vector.broadcast %c0_i32_15 : i32 to vector<1x256xi32>
    %26 = arith.cmpi slt, %22, %25 : vector<1x256xi32>
    %c0_i32_16 = arith.constant 0 : i32
    %27 = arith.cmpi slt, %20, %c0_i32_16 : i32
    %28 = vector.broadcast %27 : i1 to vector<1x256xi1>
    %29 = vector.broadcast %28 : vector<1x256xi1> to vector<1x256xi1>
    %30 = arith.xori %26, %29 : vector<1x256xi1>
    %31 = arith.andi %30, %24 : vector<1x256xi1>
    %32 = vector.broadcast %20 : i32 to vector<1x256xi32>
    %33 = arith.addi %22, %32 : vector<1x256xi32>
    %34 = arith.select %31, %33, %22 : vector<1x256xi1>, vector<1x256xi32>
    %c0_i32_17 = arith.constant 0 : i32
    %35 = vector.broadcast %c0_i32_17 : i32 to vector<1x256xi32>
    %36 = arith.cmpi sgt, %34, %35 : vector<1x256xi32>
    %c15_i32 = arith.constant 15 : i32
    %37 = vector.broadcast %c15_i32 : i32 to vector<1x256xi32>
    %38 = arith.cmpi slt, %34, %37 : vector<1x256xi32>
    %cst_18 = arith.constant 0.000000e+00 : f32
    %39 = vector.broadcast %cst_18 : f32 to vector<1x256xf32>
    %c0_19 = arith.constant 0 : index
    %c111 = arith.constant 111 : index
    %40 = vector.load %arg6[%c0_19, %c111] : memref<1x512xf32, #tpu.memory_space<vmem>>, vector<1x256xf32>
    %cst_20 = arith.constant 0.000000e+00 : f32
    %41 = vector.broadcast %cst_20 : f32 to vector<1x256xf32>
    %42 = arith.select %36, %40, %41 : vector<1x256xi1>, vector<1x256xf32>
    %c0_21 = arith.constant 0 : index
    %43 = memref.load %arg1[%c0_21] : memref<9xf32, #tpu.memory_space<smem>>
    %44 = vector.broadcast %43 : f32 to vector<1x256xf32>
    %45 = arith.mulf %44, %42 : vector<1x256xf32>
    %46 = arith.addf %39, %45 : vector<1x256xf32>
    %c0_22 = arith.constant 0 : index
    %c112 = arith.constant 112 : index
    %47 = vector.load %arg6[%c0_22, %c112] : memref<1x512xf32, #tpu.memory_space<vmem>>, vector<1x256xf32>
    %c1_23 = arith.constant 1 : index
    %48 = memref.load %arg1[%c1_23] : memref<9xf32, #tpu.memory_space<smem>>
    %49 = vector.broadcast %48 : f32 to vector<1x256xf32>
    %50 = arith.mulf %49, %47 : vector<1x256xf32>
    %51 = arith.addf %46, %50 : vector<1x256xf32>
    %c0_24 = arith.constant 0 : index
    %c113 = arith.constant 113 : index
    %52 = vector.load %arg6[%c0_24, %c113] : memref<1x512xf32, #tpu.memory_space<vmem>>, vector<1x256xf32>
    %cst_25 = arith.constant 0.000000e+00 : f32
    %53 = vector.broadcast %cst_25 : f32 to vector<1x256xf32>
    %54 = arith.select %38, %52, %53 : vector<1x256xi1>, vector<1x256xf32>
    %c2_26 = arith.constant 2 : index
    %55 = memref.load %arg1[%c2_26] : memref<9xf32, #tpu.memory_space<smem>>
    %56 = vector.broadcast %55 : f32 to vector<1x256xf32>
    %57 = arith.mulf %56, %54 : vector<1x256xf32>
    %58 = arith.addf %51, %57 : vector<1x256xf32>
    %c0_27 = arith.constant 0 : index
    %c127 = arith.constant 127 : index
    %59 = vector.load %arg6[%c0_27, %c127] : memref<1x512xf32, #tpu.memory_space<vmem>>, vector<1x256xf32>
    %cst_28 = arith.constant 0.000000e+00 : f32
    %60 = vector.broadcast %cst_28 : f32 to vector<1x256xf32>
    %61 = arith.select %36, %59, %60 : vector<1x256xi1>, vector<1x256xf32>
    %c3_29 = arith.constant 3 : index
    %62 = memref.load %arg1[%c3_29] : memref<9xf32, #tpu.memory_space<smem>>
    %63 = vector.broadcast %62 : f32 to vector<1x256xf32>
    %64 = arith.mulf %63, %61 : vector<1x256xf32>
    %65 = arith.addf %58, %64 : vector<1x256xf32>
    %c0_30 = arith.constant 0 : index
    %c128_31 = arith.constant 128 : index
    %66 = vector.load %arg6[%c0_30, %c128_31] : memref<1x512xf32, #tpu.memory_space<vmem>>, vector<1x256xf32>
    %c4 = arith.constant 4 : index
    %67 = memref.load %arg1[%c4] : memref<9xf32, #tpu.memory_space<smem>>
    %68 = vector.broadcast %67 : f32 to vector<1x256xf32>
    %69 = arith.mulf %68, %66 : vector<1x256xf32>
    %70 = arith.addf %65, %69 : vector<1x256xf32>
    %c0_32 = arith.constant 0 : index
    %c129 = arith.constant 129 : index
    %71 = vector.load %arg6[%c0_32, %c129] : memref<1x512xf32, #tpu.memory_space<vmem>>, vector<1x256xf32>
    %cst_33 = arith.constant 0.000000e+00 : f32
    %72 = vector.broadcast %cst_33 : f32 to vector<1x256xf32>
    %73 = arith.select %38, %71, %72 : vector<1x256xi1>, vector<1x256xf32>
    %c5 = arith.constant 5 : index
    %74 = memref.load %arg1[%c5] : memref<9xf32, #tpu.memory_space<smem>>
    %75 = vector.broadcast %74 : f32 to vector<1x256xf32>
    %76 = arith.mulf %75, %73 : vector<1x256xf32>
    %77 = arith.addf %70, %76 : vector<1x256xf32>
    %c0_34 = arith.constant 0 : index
    %c143 = arith.constant 143 : index
    %78 = vector.load %arg6[%c0_34, %c143] : memref<1x512xf32, #tpu.memory_space<vmem>>, vector<1x256xf32>
    %cst_35 = arith.constant 0.000000e+00 : f32
    %79 = vector.broadcast %cst_35 : f32 to vector<1x256xf32>
    %80 = arith.select %36, %78, %79 : vector<1x256xi1>, vector<1x256xf32>
    %c6 = arith.constant 6 : index
    %81 = memref.load %arg1[%c6] : memref<9xf32, #tpu.memory_space<smem>>
    %82 = vector.broadcast %81 : f32 to vector<1x256xf32>
    %83 = arith.mulf %82, %80 : vector<1x256xf32>
    %84 = arith.addf %77, %83 : vector<1x256xf32>
    %c0_36 = arith.constant 0 : index
    %c144 = arith.constant 144 : index
    %85 = vector.load %arg6[%c0_36, %c144] : memref<1x512xf32, #tpu.memory_space<vmem>>, vector<1x256xf32>
    %c7 = arith.constant 7 : index
    %86 = memref.load %arg1[%c7] : memref<9xf32, #tpu.memory_space<smem>>
    %87 = vector.broadcast %86 : f32 to vector<1x256xf32>
    %88 = arith.mulf %87, %85 : vector<1x256xf32>
    %89 = arith.addf %84, %88 : vector<1x256xf32>
    %c0_37 = arith.constant 0 : index
    %c145 = arith.constant 145 : index
    %90 = vector.load %arg6[%c0_37, %c145] : memref<1x512xf32, #tpu.memory_space<vmem>>, vector<1x256xf32>
    %cst_38 = arith.constant 0.000000e+00 : f32
    %91 = vector.broadcast %cst_38 : f32 to vector<1x256xf32>
    %92 = arith.select %38, %90, %91 : vector<1x256xi1>, vector<1x256xf32>
    %c8 = arith.constant 8 : index
    %93 = memref.load %arg1[%c8] : memref<9xf32, #tpu.memory_space<smem>>
    %94 = vector.broadcast %93 : f32 to vector<1x256xf32>
    %95 = arith.mulf %94, %92 : vector<1x256xf32>
    %96 = arith.addf %89, %95 : vector<1x256xf32>
    %cst_39 = arith.constant 0.000000e+00 : f32
    %97 = vector.broadcast %cst_39 : f32 to vector<1x256xf32>
    %98 = arith.maximumf %96, %97 : vector<1x256xf32>
    %c0_40 = arith.constant 0 : index
    %99 = memref.load %arg2[%c0_40] : memref<1xf32, #tpu.memory_space<smem>>
    %100 = vector.broadcast %99 : f32 to vector<1x256xf32>
    %101 = arith.mulf %98, %100 : vector<1x256xf32>
    %102 = arith.negf %101 : vector<1x256xf32>
    %103 = math.exp %102 : vector<1x256xf32>
    %cst_41 = arith.constant 1.000000e+00 : f32
    %104 = vector.broadcast %cst_41 : f32 to vector<1x256xf32>
    %105 = arith.addf %104, %103 : vector<1x256xf32>
    %106 = arith.divf %104, %105 : vector<1x256xf32>
    %c0_42 = arith.constant 0 : index
    %c0_43 = arith.constant 0 : index
    %107 = vector.load %arg3[%c0_42, %c0_43] : memref<8x4xf32, #tpu.memory_space<vmem>>, vector<8x1xf32>
    %c0_44 = arith.constant 0 : index
    %c1_45 = arith.constant 1 : index
    %108 = vector.load %arg3[%c0_44, %c1_45] : memref<8x4xf32, #tpu.memory_space<vmem>>, vector<8x1xf32>
    %c0_46 = arith.constant 0 : index
    %c2_47 = arith.constant 2 : index
    %109 = vector.load %arg3[%c0_46, %c2_47] : memref<8x4xf32, #tpu.memory_space<vmem>>, vector<8x1xf32>
    %c0_48 = arith.constant 0 : index
    %c3_49 = arith.constant 3 : index
    %110 = vector.load %arg3[%c0_48, %c3_49] : memref<8x4xf32, #tpu.memory_space<vmem>>, vector<8x1xf32>
    %111 = arith.addf %107, %108 : vector<8x1xf32>
    %112 = arith.addf %111, %109 : vector<8x1xf32>
    %113 = arith.addf %112, %110 : vector<8x1xf32>
    %114 = vector.broadcast %106 : vector<1x256xf32> to vector<8x256xf32>
    %115 = vector.broadcast %113 : vector<8x1xf32> to vector<8x256xf32>
    %116 = arith.mulf %114, %115 : vector<8x256xf32>
    %117 = vector.broadcast %1 : vector<1x256xf32> to vector<8x256xf32>
    %118 = vector.broadcast %107 : vector<8x1xf32> to vector<8x256xf32>
    %119 = arith.mulf %117, %118 : vector<8x256xf32>
    %120 = arith.addf %116, %119 : vector<8x256xf32>
    %121 = vector.broadcast %3 : vector<1x256xf32> to vector<8x256xf32>
    %122 = vector.broadcast %108 : vector<8x1xf32> to vector<8x256xf32>
    %123 = arith.mulf %121, %122 : vector<8x256xf32>
    %124 = arith.addf %120, %123 : vector<8x256xf32>
    %125 = vector.broadcast %5 : vector<1x256xf32> to vector<8x256xf32>
    %126 = vector.broadcast %109 : vector<8x1xf32> to vector<8x256xf32>
    %127 = arith.mulf %125, %126 : vector<8x256xf32>
    %128 = arith.addf %124, %127 : vector<8x256xf32>
    %129 = vector.broadcast %7 : vector<1x256xf32> to vector<8x256xf32>
    %130 = vector.broadcast %110 : vector<8x1xf32> to vector<8x256xf32>
    %131 = arith.mulf %129, %130 : vector<8x256xf32>
    %132 = arith.addf %128, %131 : vector<8x256xf32>
    %133 = arith.negf %132 : vector<8x256xf32>
    %134 = math.exp %133 : vector<8x256xf32>
    %cst_50 = arith.constant 1.000000e+00 : f32
    %135 = vector.broadcast %cst_50 : f32 to vector<8x256xf32>
    %136 = arith.addf %135, %134 : vector<8x256xf32>
    %137 = arith.divf %135, %136 : vector<8x256xf32>
    %c0_51 = arith.constant 0 : index
    %c0_52 = arith.constant 0 : index
    %c0_53 = arith.constant 0 : index
    %138 = vector.load %arg5[%c0_51, %c0_52, %c0_53] : memref<1x8x256xf32, #tpu.memory_space<vmem>>, vector<1x8x256xf32>
    %139 = vector.shape_cast %138 : vector<1x8x256xf32> to vector<8x256xf32>
    %140 = vector.shape_cast %137 : vector<8x256xf32> to vector<1x8x256xf32>
    tpu.vector_store %arg5[%c0_51, %c0_52, %c0_53], %140 {strides = array<i32>} : memref<1x8x256xf32, #tpu.memory_space<vmem>>, vector<1x8x256xf32>,
    return
  }
  func.func @transform_0(%arg0: i32) -> i32 {
    %c0_i32 = arith.constant 0 : i32
    %c0_i32_0 = arith.constant 0 : i32
    return %c0_i32 : i32
  }
  func.func @transform_1(%arg0: i32) -> i32 {
    %c0_i32 = arith.constant 0 : i32
    %c0_i32_0 = arith.constant 0 : i32
    return %c0_i32 : i32
  }
  func.func @transform_2(%arg0: i32) -> (i32, i32) {
    %c0_i32 = arith.constant 0 : i32
    %c0_i32_0 = arith.constant 0 : i32
    %c0_i32_1 = arith.constant 0 : i32
    return %c0_i32, %c0_i32_0 : i32, i32
  }
  func.func @transform_3(%arg0: i32) -> (i32, i32, i32) {
    %c0_i32 = arith.constant 0 : i32
    %c0_i32_0 = arith.constant 0 : i32
    %c0_i32_1 = arith.constant 0 : i32
    return %arg0, %c0_i32, %c0_i32_0 : i32, i32, i32
  }
  func.func @transform_4(%arg0: i32) -> (i32, i32, i32) {
    %c0_i32 = arith.constant 0 : i32
    %c0_i32_0 = arith.constant 0 : i32
    %c0_i32_1 = arith.constant 0 : i32
    return %arg0, %c0_i32, %c0_i32_0 : i32, i32, i32
  }
}

</mosaic_0001>

<bundles_post_ra>
// kernel: spatial_attention.1
= control target key start
LH: loop header
LB: loop body
LE: loop exit
PB: predicated region body
PF: predicated region fallthrough
CT: control target
= control target key end

     0   :  { %s1000_s0 = inlined_call_operand.vmem [shape: f32[9], index: 0, kind: input, shape index: {}]   ;;  %s1001_s1 = inlined_call_operand.<no memory space> [shape: f32[1], index: 1, kind: input, shape index: {}]   ;;  %s1002_s2 = inlined_call_operand.vmem [shape: f32[8,4], index: 2, kind: input, shape index: {}]   ;;  %s1003_s3 = inlined_call_operand.vmem [shape: f32[2,4,256], index: 3, kind: input, shape index: {}]   ;;  %s1004_s4 = inlined_call_operand.vmem [shape: f32[2,8,256], index: 4, kind: output, shape index: {}]  }
   0x1   :  { %9 = sst [smem:[#allocation3]] %s1001_s1 }
   0x2   :  { %10 = vsyncpa [#allocation5], 0  ;;  %s841_s17 = smov 0  }
   0x3 LB: > { %s847_s18 = sadd.s32 4294967295, %s795_s17   ;;  %p687_p0 = scmp.ge.s32.totalorder %s795_s17, 1  ;;  %s795_s17 = sphi %s841_s17, %s16_s17  }
   0x4   : > { %p136_p1 = scmp.lt.s32.totalorder %s795_s17, 3  ;;  %s149_s1 = sshll.u32 %s1000_s0, 4  ;;  %s150_s1 = int_to_ptr.vmem [resolvable:$true] %s149_s1 }
   0x5   : > { %p723_p3 = scmp.eq.s32.totalorder %s847_s18, 0  ;;  %s770_s22 = scalar_lea.vmem %s150_s1, 16 }
   0x6   : > { %p854_p2 = pnand %p687_p0, %p136_p1  ;;  %p771_p6 = scmp.ne.s32.totalorder %s150_s1, %s770_s22 }
   0x7   : > { %p778_p10 = scmp.lt.s32.totalorder %s150_s1, %s150_s1  ;;  %p779_p11 = scmp.lt.s32.totalorder %s770_s22, %s770_s22 }
   0x8   : > { %p719_p4 = pneg %p854_p2 }
   0x9   : > { %p780_p12 = por %p779_p11, %p778_p10 }
   0xa   : > { %p720_p5 = pnand %p723_p3, %p719_p4 }
   0xc   : > { %p772_p7 = pneg %p720_p5 }
   0xe   : > { %p773_p8 = pnand %p772_p7, %p771_p6 }
  0x10   : > { %p774_p9 = pneg %p773_p8 }
  0x12   : > { %p781_p13 = pnand %p780_p12, %p774_p9 }
  0x14   : > { %784 = shalt.err (!%p781_p13)
}
  0x15   : > { %s797_s23 = smov [#allocation4]   ;;  %176 = sbr.rel (%p854_p2) target bundleno = 322 (0x142), region = 36 }
  0x16   : > { %722 = dma.vmem_to_smem (!%p720_p5), %s150_s1, 16, %s797_s23, [#allocation5]  }
  0x1c   : > { %790 = dma.done.wait (%p723_p3), [#allocation5], 16  }
  0x1d   : > { %792 = vsyncadd (%p723_p3), [#allocation5], 4294967280 }
  0x1e   : > { %182 = sfence }
  0x1f   : > { %v872_v0 = vld [vmem:[%s1002_s2] sm:$0xff]  ;;  %v224_v1 = vlaneseq  ;;  %s798_s26 = smov 127   ;;  %p203_p0 = scmp.lt.s32.totalorder %s847_s18, 1  ;;  %v799_v2 = vmov 1   ;;  %v801_v3 = vmov 0   ;;  %v802_v4 = vmov 0.0  }
  0x20   : > { %501 = vrot.lane.b32.xlu0 %v872_v0, %s798_s26  ;;  %750 = vset.pattern.permute.xlu1 %v799_v2  ;;  %s800_s27 = smov 125   ;;  %s803_s28 = smov 126   ;;  %v811_v35 = vmov 3   ;;  %v812_v42 = vmov 2   ;;  %vm284_vm2 = vcmask 138240   ;;  %vm332_vm5 = vcmask 121856  }
  0x21   : > { %509 = vrot.lane.b32.xlu1 %v872_v0, %s800_s27  ;;  %vm226_vm0 = vcmp.lt.s32.totalorder %v224_v1, 128  ;;  %749 = vset.pattern.permute.xlu0 %v801_v3  ;;  %s1015_s18 = smov (!%p203_p0, %s847_s18), 1  ;;  %vm230_vm1 = vcmp.lt.s32.totalorder %v224_v1, 256  ;;  %v267_v13 = vshrl.u32 %v224_v1, 7  ;;  %s699_s7 = sld [smem:[#allocation4 + $0x1]]  ;;  %v234_v51 = vand.u32 127, %v224_v1 }
  0x22   : > { %228 = vst.msk [vmem:[#allocation2] sm:$0x1] %vm226_vm0, %v802_v4  ;;  %229 = vst.msk [vmem:[#allocation2 + $0x3] sm:$0x1] %vm226_vm0, %v802_v4  ;;  %s713_s29 = sshll.u32 %s1015_s18, 3  ;;  %s804_s8 = smov 17  }
  0x23   : > { %s207_s6 = scalar_lea.vmem %s1003_s3, %s713_s29  ;;  %v902_v14 = vsub.s32 0, %v267_v13  ;;  %v904_v15 = vsub.s32 1, %v267_v13  ;;  %v276_v16 = vsub.s32 2, %v267_v13  ;;  %s805_s9 = smov 15   ;;  %v235_v54 = vadd.s32 128, %v234_v51 }
  0x24   : > { %505 = vrot.lane.b32.xlu0 %v872_v0, %s803_s28  ;;  %v888_v5 = vld [vmem:[%s207_s6] ss:$4 sm:$0x3]  ;;  %v890_v6 = vld [vmem:[%s207_s6 + $0x1] ss:$4 sm:$0x3] }
  0x25   : > { %v892_v7 = vld [vmem:[%s207_s6 + $0x2] ss:$4 sm:$0x3]  ;;  %v220_v8 = vadd.f32 %v890_v6, %v888_v5  ;;  %v896_v9 = vld [vmem:[%s207_s6 + $0x3] ss:$4 sm:$0x3] }
  0x26   : > { %s806_s10 = smov 1   ;;  %s807_s11 = smov 16   ;;  %v240_v57 = vand.u32 15, %v234_v51  ;;  %v247_v58 = vand.u32 15, %v235_v54  ;;  %vm319_vm7 = vcmask 130048   ;;  %vm351_vm9 = vcmask 7168  }
  0x27   : > { %v221_v10 = vadd.f32 %v892_v7, %v220_v8  ;;  %v298_v21 = vstv %s699_s7  ;;  %s705_s12 = sld [smem:[#allocation4 + $0x7]]  ;;  %s808_s13 = smov 113   ;;  %vm401_vm10 = vcmask 1039360   ;;  %vm420_vm11 = vcmask 924672  }
  0x28   : > { %s809_s14 = smov 111   ;;  %s810_s15 = smov 112   ;;  %vm926_vm3 = vcmp.gt.s32.totalorder %v240_v57, 0  ;;  %vm930_vm4 = vcmp.gt.s32.totalorder %v247_v58, 0  ;;  %vm942_vm6 = vcmp.lt.s32.totalorder %v240_v57, 15  ;;  %vm946_vm8 = vcmp.lt.s32.totalorder %v247_v58, 15 }
  0x29   : > { %v222_v11 = vadd.f32 %v896_v9, %v221_v10  ;;  %s291_s16 = sld [smem:[#allocation4]]  ;;  %s924_s19 = sld [smem:[#allocation4 + $0x2]]  ;;  %vm468_vm12 = vcmask 908288   ;;  %vm455_vm13 = vcmask 916480  }
  0x2a   : > { %s934_s20 = sld [smem:[#allocation4 + $0x3]]  ;;  %s938_s1 = sld [smem:[#allocation4 + $0x4]] }
  0x2b   : > { %v223_v12 = vmul.f32 0.25, %v222_v11  ;;  %s703_s21 = sld [smem:[#allocation4 + $0x5]]  ;;  %s704_s22 = sld [smem:[#allocation4 + $0x6]] }
  0x2c   : > { %s706_s23 = sld [smem:[#allocation4 + $0x8]]  ;;  %s714_s25 = sshll.u32 %s1015_s18, 4 }
  0x2d   : > { %232 = vst.msk [vmem:[#allocation2 + $0x1] sm:$0x3] %vm230_vm1, %v223_v12  ;;  %v434_v30 = vstv %s705_s12  ;;  %s483_s24 = sld [smem:[#allocation3]]  ;;  %s212_s28 = scalar_lea.vmem %s1004_s4, %s714_s25 }
  0x2f   : > { %v292_v1 = vstv %s291_s16 }
  0x34   : > { %v264_v17 = vld [vmem:[#allocation2] sm:$0x7] }
  0x35   : > { %v273_v18 = vrot.slane %v264_v17, %v904_v15  ;;  %v269_v19 = vrot.slane %v264_v17, %v902_v14  ;;  %v277_v20 = vrot.slane %v264_v17, %v276_v16  ;;  %v299_v22 = vmul.f32 %v298_v21, %v264_v17  ;;  %v381_v26 = vld [vmem:[#allocation2 + $0x1] sm:$0x7] }
  0x36   : > { %v390_v27 = vrot.slane %v381_v26, %v904_v15  ;;  %v386_v28 = vrot.slane %v381_v26, %v902_v14  ;;  %v394_v29 = vrot.slane %v381_v26, %v276_v16  ;;  %v435_v31 = vmul.f32 %v434_v30, %v381_v26 }
  0x37   : > { %280 = vrot.lane.b32.xlu0 %v273_v18, %s804_s8  ;;  %278 = vrot.lane.b32.xlu1 %v269_v19, %s804_s8  ;;  %v308_v23 = vrot.slane %v299_v22, %v904_v15  ;;  %v304_v24 = vrot.slane %v299_v22, %v902_v14  ;;  %v312_v25 = vrot.slane %v299_v22, %v276_v16  ;;  %v359_v26 = vstv %s934_s20 }
  0x38   : > { %v440_v32 = vrot.slane %v435_v31, %v902_v14  ;;  %v448_v33 = vrot.slane %v435_v31, %v276_v16  ;;  %v444_v34 = vrot.slane %v435_v31, %v904_v15 }
  0x3b   : > { %326 = vrot.lane.b32.xlu0 %v269_v19, %s805_s9  ;;  %282 = vrot.lane.b32.xlu1 %v277_v20, %s804_s8 }
  0x3f   : > { %330 = vrot.lane.b32.xlu0 %v277_v20, %s805_s9  ;;  %328 = vrot.lane.b32.xlu1 %v273_v18, %s805_s9 }
  0x43   : > { %345 = vrot.lane.b32.xlu0 %v269_v19, %s806_s10  ;;  %347 = vrot.lane.b32.xlu1 %v273_v18, %s806_s10  ;;  %v340_v18 = vstv %s924_s19 }
  0x47   : > { %315 = vrot.lane.b32.xlu0 %v308_v23, %s807_s11  ;;  %313 = vrot.lane.b32.xlu1 %v304_v24, %s807_s11 }
  0x4b   : > { %349 = vrot.lane.b32.xlu0 %v277_v20, %s806_s10  ;;  %317 = vrot.lane.b32.xlu1 %v312_v25, %s807_s11 }
  0x4f   : > { %397 = vrot.lane.b32.xlu0 %v390_v27, %s798_s26  ;;  %395 = vrot.lane.b32.xlu1 %v386_v28, %s798_s26 }
  0x53   : > { %414 = vrot.lane.b32.xlu0 %v386_v28, %s808_s13  ;;  %399 = vrot.lane.b32.xlu1 %v394_v29, %s798_s26 }
  0x57   : > { %418 = vrot.lane.b32.xlu0 %v394_v29, %s808_s13  ;;  %416 = vrot.lane.b32.xlu1 %v390_v27, %s808_s13 }
  0x5b   : > { %464 = vrot.lane.b32.xlu0 %v390_v27, %s809_s14  ;;  %462 = vrot.lane.b32.xlu1 %v386_v28, %s809_s14 }
  0x5f   : > { %449 = vrot.lane.b32.xlu0 %v440_v32, %s810_s15  ;;  %466 = vrot.lane.b32.xlu1 %v394_v29, %s809_s14  ;;  %v364_v32 = vld [vmem:[#allocation2 + $0x1] sm:$0x3] }
  0x63   : > { %453 = vrot.lane.b32.xlu0 %v448_v33, %s810_s15  ;;  %451 = vrot.lane.b32.xlu1 %v444_v34, %s810_s15  ;;  %v366_v33 = vstv %s938_s1 }
  0x67   : > { %559 = vperm.xlu1 %750, %v872_v0   ;;  %540 = vperm.xlu0 %749, %v872_v0  }
  0x6b   : > { %751 = vset.pattern.permute.xlu1 %v801_v3  ;;  %753 = vset.pattern.permute.xlu0 %v811_v35 }
  0x6c   : > { %597 = vperm.xlu0 %753, %v872_v0  }
  0x92   : > { %v502_v36 = vpop.permute.xlu0 %501 }
  0x93   : > { %v504_v37 = vadd.f32 %v502_v36, %v872_v0  ;;  %v510_v39 = vpop.permute.xlu1 %509 }
  0x96   : > { %v506_v38 = vpop.permute.xlu0 %505 }
  0x97   : > { %v508_v40 = vadd.f32 %v506_v38, %v504_v37  ;;  %v367_v38 = vmul.f32 %v366_v33, %v364_v32 }
  0x99   : > { %v512_v41 = vadd.f32 %v510_v39, %v508_v40 }
  0x9b   : > { %523 = vperm.xlu1 %751, %v512_v41  }
  0x9f   : > { %752 = vset.pattern.permute.xlu1 %v812_v42 }
  0xa0   : > { %578 = vperm.xlu1 %752, %v872_v0  }
  0xa9   : > { %v281_v43 = vpop.permute.xlu0 %280  ;;  %v279_v44 = vpop.permute.xlu1 %278 }
  0xaa   : > { %v285_v62 = vsel %vm284_vm2, %v279_v44, %v281_v43 }
  0xab   : > { %v289_v2 = vsel %vm926_vm3, %v285_v62, 0.0 }
  0xac   : > { %v293_v16 = vmul.f32 %v292_v1, %v289_v2 }
  0xad   : > { %v327_v45 = vpop.permute.xlu0 %326  ;;  %v283_v46 = vpop.permute.xlu1 %282 }
  0xae   : > { %v286_v0 = vsel %vm284_vm2, %v281_v43, %v283_v46  ;;  %v372_v46 = vrot.slane %v367_v38, %v902_v14 }
  0xaf   : > { %v290_v3 = vsel %vm930_vm4, %v286_v0, 0.0 }
  0xb0   : > { %v294_v17 = vmul.f32 %v292_v1, %v290_v3 }
  0xb1   : > { %v331_v47 = vpop.permute.xlu0 %330  ;;  %v329_v48 = vpop.permute.xlu1 %328 }
  0xb2   : > { %v333_v8 = vsel %vm332_vm5, %v327_v45, %v329_v48  ;;  %v334_v12 = vsel %vm332_vm5, %v329_v48, %v331_v47  ;;  %v409_v48 = vstv %s703_s21 }
  0xb3   : > { %v337_v19 = vsel %vm942_vm6, %v333_v8, 0.0  ;;  %v338_v21 = vsel %vm946_vm8, %v334_v12, 0.0 }
  0xb4   : > { %v341_v25 = vmul.f32 %v340_v18, %v337_v19  ;;  %v342_v29 = vmul.f32 %v340_v18, %v338_v21  ;;  %v476_v18 = vstv %s706_s23 }
  0xb5   : > { %v346_v49 = vpop.permute.xlu0 %345  ;;  %v348_v50 = vpop.permute.xlu1 %347 }
  0xb6   : > { %v352_v22 = vsel %vm351_vm9, %v346_v49, %v348_v50 }
  0xb7   : > { %v356_v30 = vsel %vm926_vm3, %v352_v22, 0.0 }
  0xb8   : > { %v360_v36 = vmul.f32 %v359_v26, %v356_v30 }
  0xb9   : > { %v316_v52 = vpop.permute.xlu0 %315  ;;  %v314_v53 = vpop.permute.xlu1 %313 }
  0xba   : > { %v320_v20 = vsel %vm319_vm7, %v314_v53, %v316_v52 }
  0xbb   : > { %v324_v27 = vadd.f32 %v320_v20, %v293_v16 }
  0xbd   : > { %v350_v55 = vpop.permute.xlu0 %349  ;;  %v318_v56 = vpop.permute.xlu1 %317  ;;  %v343_v37 = vadd.f32 %v341_v25, %v324_v27 }
  0xbe   : > { %v321_v23 = vsel %vm319_vm7, %v316_v52, %v318_v56  ;;  %v353_v24 = vsel %vm351_vm9, %v348_v50, %v350_v55  ;;  %v376_v50 = vrot.slane %v367_v38, %v904_v15 }
  0xbf   : > { %v325_v31 = vadd.f32 %v321_v23, %v294_v17  ;;  %v357_v35 = vsel %vm930_vm4, %v353_v24, 0.0  ;;  %v362_v45 = vadd.f32 %v360_v36, %v343_v37 }
  0xc0   : > { %v361_v39 = vmul.f32 %v359_v26, %v357_v35 }
  0xc1   : > { %v398_v59 = vpop.permute.xlu0 %397  ;;  %v396_v60 = vpop.permute.xlu1 %395  ;;  %v344_v40 = vadd.f32 %v342_v29, %v325_v31  ;;  %v379_v54 = vadd.f32 %v372_v46, %v362_v45  ;;  %v484_v29 = vstv %s483_s24 }
  0xc2   : > { %v402_v41 = vsel %vm401_vm10, %v396_v60, %v398_v59 }
  0xc3   : > { %v363_v47 = vadd.f32 %v361_v39, %v344_v40  ;;  %v406_v49 = vsel %vm942_vm6, %v402_v41, 0.0  ;;  %v532_v39 = vrot.slane %v888_v5, %v902_v14  ;;  %v536_v40 = vrot.slane %v888_v5, %v904_v15 }
  0xc4   : > { %v410_v55 = vmul.f32 %v409_v48, %v406_v49  ;;  %v570_v5 = vrot.slane %v892_v7, %v902_v14 }
  0xc5   : > { %v400_v10 = vpop.permute.xlu1 %399  ;;  %v415_v13 = vpop.permute.xlu0 %414  ;;  %v380_v57 = vadd.f32 %v376_v50, %v363_v47 }
  0xc6   : > { %v403_v43 = vsel %vm401_vm10, %v398_v59, %v400_v10  ;;  %v428_v59 = vstv %s704_s22  ;;  %v412_v1 = vadd.f32 %v410_v55, %v379_v54 }
  0xc7   : > { %v407_v51 = vsel %vm946_vm8, %v403_v43, 0.0  ;;  %v551_v43 = vrot.slane %v890_v6, %v902_v14 }
  0xc8   : > { %v411_v58 = vmul.f32 %v409_v48, %v407_v51 }
  0xc9   : > { %v417_v28 = vpop.permute.xlu1 %416  ;;  %v419_v34 = vpop.permute.xlu0 %418 }
  0xca   : > { %v421_v52 = vsel %vm420_vm11, %v415_v13, %v417_v28  ;;  %v422_v53 = vsel %vm420_vm11, %v417_v28, %v419_v34  ;;  %v413_v3 = vadd.f32 %v411_v58, %v380_v57 }
  0xcb   : > { %v425_v60 = vsel %vm926_vm3, %v421_v52, 0.0  ;;  %v426_v0 = vsel %vm930_vm4, %v422_v53, 0.0  ;;  %v574_v52 = vrot.slane %v892_v7, %v904_v15  ;;  %v589_v53 = vrot.slane %v896_v9, %v902_v14 }
  0xcc   : > { %v429_v2 = vmul.f32 %v428_v59, %v425_v60  ;;  %v430_v8 = vmul.f32 %v428_v59, %v426_v0 }
  0xcd   : > { %v463_v42 = vpop.permute.xlu1 %462  ;;  %v465_v44 = vpop.permute.xlu0 %464 }
  0xce   : > { %v469_v10 = vsel %vm468_vm12, %v463_v42, %v465_v44  ;;  %v431_v17 = vadd.f32 %v429_v2, %v412_v1  ;;  %v432_v19 = vadd.f32 %v430_v8, %v413_v3 }
  0xcf   : > { %v473_v61 = vsel %vm942_vm6, %v469_v10, 0.0 }
  0xd0   : > { %v477_v22 = vmul.f32 %v476_v18, %v473_v61 }
  0xd1   : > { %v467_v56 = vpop.permute.xlu1 %466  ;;  %v450_v62 = vpop.permute.xlu0 %449 }
  0xd2   : > { %v470_v13 = vsel %vm468_vm12, %v465_v44, %v467_v56  ;;  %v555_v44 = vrot.slane %v890_v6, %v904_v15  ;;  %v593_v6 = vrot.slane %v896_v9, %v904_v15 }
  0xd3   : > { %v474_v63 = vsel %vm946_vm8, %v470_v13, 0.0 }
  0xd4   : > { %v478_v24 = vmul.f32 %v476_v18, %v474_v63 }
  0xd5   : > { %v452_v12 = vpop.permute.xlu1 %451  ;;  %v454_v16 = vpop.permute.xlu0 %453 }
  0xd6   : > { %v456_v20 = vsel %vm455_vm13, %v450_v62, %v452_v12  ;;  %v457_v21 = vsel %vm455_vm13, %v452_v12, %v454_v16 }
  0xd7   : > { %v460_v23 = vadd.f32 %v456_v20, %v431_v17  ;;  %v461_v25 = vadd.f32 %v457_v21, %v432_v19 }
  0xd9   : > { %v479_v26 = vadd.f32 %v477_v22, %v460_v23  ;;  %v480_v27 = vadd.f32 %v478_v24, %v461_v25 }
  0xdb   : > { %v481_v28 = vmax.f32 %v479_v26, 0.0  ;;  %v482_v30 = vmax.f32 %v480_v27, 0.0 }
  0xdd   : > { %v485_v31 = vmul.f32 %v484_v29, %v481_v28  ;;  %v486_v32 = vmul.f32 %v484_v29, %v482_v30 }
  0xdf   : > { %v707_v4 = vmul.f32 -1.442695, %v485_v31  ;;  %v708_v33 = vmul.f32 -1.442695, %v486_v32 }
  0xe1   : > { %754 = vpow2.f32 %v707_v4 }
  0xe2   : > { %756 = vpow2.f32 %v708_v33 }
  0xe6   : > { %v560_v37 = vpop.permute.xlu1 %559  ;;  %v541_v42 = vpop.permute.xlu0 %540 }
  0xe7   : > { %v543_v45 = vmul.f32 %v541_v42, %v532_v39  ;;  %v544_v46 = vmul.f32 %v541_v42, %v536_v40  ;;  %v562_v54 = vmul.f32 %v560_v37, %v551_v43  ;;  %v563_v55 = vmul.f32 %v560_v37, %v555_v44 }
  0xeb   : > { %v755_v34 = vpop.eup %754  ;;  %v598_v58 = vpop.permute.xlu0 %597 }
  0xec   : > { %v757_v11 = vpop.eup %756  ;;  %v493_v35 = vadd.f32 1.0, %v755_v34  ;;  %v600_v2 = vmul.f32 %v598_v58, %v589_v53  ;;  %v601_v3 = vmul.f32 %v598_v58, %v593_v6 }
  0xed   : > { %v494_v36 = vadd.f32 1.0, %v757_v11 }
  0xee   : > { %758 = vrcp.f32 %v493_v35 }
  0xef   : > { %760 = vrcp.f32 %v494_v36 }
  0xf8   : > { %v759_v38 = vpop.eup %758 }
  0xf9   : > { %v761_v41 = vpop.eup %760  ;;  %v516_v47 = vrot.slane %v759_v38, %v902_v14 }
  0xfa   : > { %v520_v48 = vrot.slane %v761_v41, %v902_v14 }
 0x11a   : > { %v524_v49 = vpop.permute.xlu1 %523 }
 0x11b   : > { %v526_v50 = vmul.f32 %v524_v49, %v516_v47  ;;  %v527_v51 = vmul.f32 %v524_v49, %v520_v48 }
 0x11d   : > { %v545_v56 = vadd.f32 %v543_v45, %v526_v50  ;;  %v546_v57 = vadd.f32 %v544_v46, %v527_v51 }
 0x11f   : > { %v564_v59 = vadd.f32 %v562_v54, %v545_v56  ;;  %v565_v60 = vadd.f32 %v563_v55, %v546_v57  ;;  %v579_v62 = vpop.permute.xlu1 %578 }
 0x120   : > { %v581_v0 = vmul.f32 %v579_v62, %v570_v5  ;;  %v582_v1 = vmul.f32 %v579_v62, %v574_v52 }
 0x122   : > { %v583_v7 = vadd.f32 %v581_v0, %v564_v59  ;;  %v584_v8 = vadd.f32 %v582_v1, %v565_v60 }
 0x124   : > { %v602_v10 = vadd.f32 %v600_v2, %v583_v7  ;;  %v603_v14 = vadd.f32 %v601_v3, %v584_v8 }
 0x126   : > { %v709_v12 = vmul.f32 -1.442695, %v602_v10  ;;  %v710_v13 = vmul.f32 -1.442695, %v603_v14 }
 0x128   : > { %762 = vpow2.f32 %v709_v12 }
 0x129   : > { %764 = vpow2.f32 %v710_v13 }
 0x132   : > { %v763_v9 = vpop.eup %762 }
 0x133   : > { %v765_v15 = vpop.eup %764  ;;  %v610_v16 = vadd.f32 1.0, %v763_v9 }
 0x134   : > { %v611_v17 = vadd.f32 1.0, %v765_v15 }
 0x135   : > { %766 = vrcp.f32 %v610_v16 }
 0x136   : > { %768 = vrcp.f32 %v611_v17 }
 0x13f   : > { %v767_v18 = vpop.eup %766 }
 0x140   : > { %v769_v61 = vpop.eup %768  ;;  %616 = vst [vmem:[%s212_s28] sm:$0xff] %v767_v18 }
 0x141   : > { %617 = vst [vmem:[%s212_s28 + $0x8] sm:$0xff] %v769_v61 }
 0x142 PF: > { %s16_s17 = sadd.s32 1, %s795_s17  }
 0x143   : > { %p13_p1 = scmp.ge.s32.totalorder %s16_s17, 4  }
 0x145   :  { %15 = sbr.rel (!%p13_p1) target bundleno = 3 (0x3), region = 74 }
 0x14c   :  { %639 = vsyncpa [#allocation5], 1 }
 0x14d   :  { %641 = vsyncpa [#allocation5 + $0x1], 1 }

</bundles_post_ra>
